<compile_context>
chip_gen: v6e
topology: v6e:2x2x1
jax: 0.10.0
libtpu: 0.0.40
codegen_flags: <defaults>
</compile_context>

<pallas_src>
import math

import jax
import jax.numpy as jnp
from jax.experimental import pallas as pl
from jax.experimental.pallas import tpu as pltpu

HIDDEN_PAD = 128  # hidden dim padded to one full lane width


def _round_up(n, m):
    return ((n + m - 1) // m) * m


# ----------------------------------------------------------------------------
# Pallas kernel: fused 3-layer MLP discriminator head + sigmoid
# ----------------------------------------------------------------------------
def _mish(v):
    # mish(v) = v * tanh(softplus(v)).  With u = 1 + exp(v):
    #   tanh(log(u)) = (u^2 - 1) / (u^2 + 1)
    # -> 1 EUP exp + 1 approx reciprocal (instead of exp, log1p, tanh).
    # Clamp before exp: for v > 20 the ratio is exactly 1.0 in f32 (mish(v) == v),
    # and the clamp avoids inf/inf.
    e = jnp.exp(jnp.minimum(v, 20.0))
    u2 = (1.0 + e) * (1.0 + e)
    return v * (u2 - 1.0) * pl.reciprocal(u2 + 1.0, approx=True)


def _disc_mlp_kernel(x_ref, c_ref, e_ref,
                     w1x_ref, w1c_ref, w1e_ref, b1_ref,
                     w2_ref, b2_ref, w3_ref, b3_ref,
                     out_ref):
    # x_ref : [TB, X]   flattened trajectory block
    # c_ref : [TB, C]   conditioning features
    # e_ref : [TB, E]   sinusoidal time embedding
    # w1*   : row-slices of W1 -> [X|C|E, 128], b1: [1, 128]
    # w2    : [128, 128], b2: [1, 128]
    # w3    : [1, 128] (row vector), b3: [1, 1]
    # out   : [TB, 1] = sigmoid(logit)
    bf16 = jnp.bfloat16

    # Layer 1: fused concat via three partial dots (bf16 operands, f32 accumulate).
    h = jnp.dot(x_ref[...].astype(bf16), w1x_ref[...].astype(bf16),
                preferred_element_type=jnp.float32)
    h = h + jnp.dot(c_ref[...].astype(bf16), w1c_ref[...].astype(bf16),
                    preferred_element_type=jnp.float32)
    h = h + jnp.dot(e_ref[...].astype(bf16), w1e_ref[...].astype(bf16),
                    preferred_element_type=jnp.float32)
    h = _mish(h + b1_ref[...])

    # Layer 2
    h = jnp.dot(h.astype(bf16), w2_ref[...].astype(bf16),
                preferred_element_type=jnp.float32)
    h = _mish(h + b2_ref[...])

    # Layer 3 (output width 1): VPU multiply + lane reduction, no MXU pass.
    logit = jnp.sum(h * w3_ref[...], axis=-1, keepdims=True) + b3_ref[...]

    # Sigmoid (exact divide: only TB elements, keeps probs strictly in [0, 1]).
    out_ref[...] = 1.0 / (1.0 + jnp.exp(-logit))


def _disc_mlp_call(x_flat, cond, temb, params):
    B, X = x_flat.shape
    C = cond.shape[1]
    E = temb.shape[1]

    # Batch tile: multiple of 8 sublanes, capped so VMEM stays tiny.
    TB = min(256, _round_up(B, 8))
    B_pad = _round_up(B, TB)
    pad = B_pad - B
    if pad:
        x_flat = jnp.pad(x_flat, ((0, pad), (0, 0)))
        cond = jnp.pad(cond, ((0, pad), (0, 0)))
        temb = jnp.pad(temb, ((0, pad), (0, 0)))

    def batch_spec(width):
        return pl.BlockSpec((TB, width), lambda i: (i, 0))

    def fixed_spec(rows, cols):
        # grid-invariant (weights / biases): same block for every grid step
        return pl.BlockSpec((rows, cols), lambda i: (0, 0))

    out = pl.pallas_call(
        _disc_mlp_kernel,
        out_shape=jax.ShapeDtypeStruct((B_pad, 1), jnp.float32),
        grid_spec=pltpu.PrefetchScalarGridSpec(
            num_scalar_prefetch=0,
            grid=(B_pad // TB,),
            in_specs=[
                batch_spec(X), batch_spec(C), batch_spec(E),
                fixed_spec(X, HIDDEN_PAD),
                fixed_spec(C, HIDDEN_PAD),
                fixed_spec(E, HIDDEN_PAD),
                fixed_spec(1, HIDDEN_PAD),
                fixed_spec(HIDDEN_PAD, HIDDEN_PAD),
                fixed_spec(1, HIDDEN_PAD),
                fixed_spec(1, HIDDEN_PAD),
                fixed_spec(1, 1),
            ],
            out_specs=pl.BlockSpec((TB, 1), lambda i: (i, 0)),
        ),
        compiler_params=pltpu.CompilerParams(
            dimension_semantics=("parallel",)),
    )(x_flat, cond, temb,
      params["w1x"], params["w1c"], params["w1t"], params["b1"],
      params["w2"], params["b2"], params["w3"], params["b3"])
    return out[:B]


# ----------------------------------------------------------------------------
# Glue: sinusoidal timestep embedding (diffuser SinusoidalPosEmb semantics)
# ----------------------------------------------------------------------------
def sinusoidal_pos_emb(t, dim):
    half = dim // 2
    denom = max(half - 1, 1)
    freqs = jnp.exp(
        jnp.arange(half, dtype=jnp.float32) * -(math.log(10000.0) / denom))
    args = t.astype(jnp.float32)[:, None] * freqs[None, :]
    return jnp.concatenate([jnp.sin(args), jnp.cos(args)], axis=-1)


# ----------------------------------------------------------------------------
# Deterministic parameter init (synthetic weights, hidden dim padded to 128)
# ----------------------------------------------------------------------------
def init_params(key, x_dim, cond_dim, time_dim, hidden=32):
    d_in = x_dim + cond_dim + time_dim
    ks = jax.random.split(key, 3)

    def linear(k, fan_in, fan_out):
        scale = 1.0 / math.sqrt(fan_in)
        w = jax.random.uniform(k, (fan_in, fan_out), jnp.float32, -scale, scale)
        b = jnp.zeros((fan_out,), jnp.float32)
        return w, b

    w1, b1 = linear(ks[0], d_in, hidden)
    w2, b2 = linear(ks[1], hidden, hidden)
    w3, b3 = linear(ks[2], hidden, 1)

    hp = HIDDEN_PAD - hidden  # zero-pad hidden -> 128 (exact: pads stay 0 thru Mish)
    w1p = jnp.pad(w1, ((0, 0), (0, hp)))
    return {
        "w1x": w1p[:x_dim],
        "w1c": w1p[x_dim:x_dim + cond_dim],
        "w1t": w1p[x_dim + cond_dim:],
        "b1": jnp.pad(b1, (0, hp)).reshape(1, HIDDEN_PAD),
        "w2": jnp.pad(w2, ((0, hp), (0, hp))),
        "b2": jnp.pad(b2, (0, hp)).reshape(1, HIDDEN_PAD),
        "w3": jnp.pad(w3[:, 0], (0, hp)).reshape(1, HIDDEN_PAD),
        "b3": b3.reshape(1, 1),
    }


# ----------------------------------------------------------------------------
# TrajectoryDiscriminator.forward equivalent
# ----------------------------------------------------------------------------
def trajectory_discriminator_forward(params, x_t, cond, t, time_dim=32):
    """out = sigmoid(model(x_t, cond, t)); returns [B, 1] float32 probs."""
    # TODO(synk): diffuser's `cond` is a dict applied via apply_conditioning (state
    # overwrite at horizon indices); the wrapped model is abstract, so cond is
    # represented here as a dense conditioning feature vector.
    B = x_t.shape[0]
    temb = sinusoidal_pos_emb(t, time_dim)                 # [B, E]
    x_flat = x_t.reshape(B, -1).astype(jnp.float32)        # [B, H*T] (free reshape)
    return _disc_mlp_call(x_flat, cond.astype(jnp.float32), temb, params)


# Pure-JAX reference (f32 everywhere) for a loose correctness check.
def _reference_forward(params, x_flat, cond, temb):
    feats = jnp.concatenate([x_flat, cond, temb], axis=-1)
    w1 = jnp.concatenate([params["w1x"], params["w1c"], params["w1t"]], axis=0)

    def mish(v):
        return v * jnp.tanh(jnp.log1p(jnp.exp(v)))

    h = mish(feats @ w1 + params["b1"])
    h = mish(h @ params["w2"] + params["b2"])
    logit = jnp.sum(h * params["w3"], axis=-1, keepdims=True) + params["b3"]
    return jax.nn.sigmoid(logit)


if __name__ == "__main__":
    key = jax.random.PRNGKey(0)
    k_x, k_c, k_t, k_p = jax.random.split(key, 4)

    B, H, Tdim = 2, 8, 4            # batch, horizon, transition_dim
    cond_dim, time_dim, hidden = 4, 32, 32

    x_t = jax.random.normal(k_x, (B, H, Tdim), jnp.float32)
    cond = jax.random.normal(k_c, (B, cond_dim), jnp.float32)
    t = jax.random.randint(k_t, (B,), 0, 100)

    params = init_params(k_p, H * Tdim, cond_dim, time_dim, hidden)

    probs = trajectory_discriminator_forward(params, x_t, cond, t, time_dim)
    jax.block_until_ready(probs)

    assert probs.shape == (B, 1)
    assert bool(jnp.all(jnp.isfinite(probs)))
    assert bool(jnp.all((probs >= 0.0) & (probs <= 1.0)))

    ref = _reference_forward(params, x_t.reshape(B, -1), cond,
                             sinusoidal_pos_emb(t, time_dim))
    assert bool(jnp.allclose(probs, ref, atol=5e-2)), (probs, ref)

    print("KERNEL_OK")
</pallas_src>

<mosaic_0001>
module attributes {stable_mosaic.version = 11 : i64} {
  func.func @_disc_mlp_kernel(%arg0: i32, %arg1: memref<8x32xf32, #tpu.memory_space<vmem>>, %arg2: memref<8x4xf32, #tpu.memory_space<vmem>>, %arg3: memref<8x32xf32, #tpu.memory_space<vmem>>, %arg4: memref<32x128xf32, #tpu.memory_space<vmem>>, %arg5: memref<4x128xf32, #tpu.memory_space<vmem>>, %arg6: memref<32x128xf32, #tpu.memory_space<vmem>>, %arg7: memref<1x128xf32, #tpu.memory_space<vmem>>, %arg8: memref<128x128xf32, #tpu.memory_space<vmem>>, %arg9: memref<1x128xf32, #tpu.memory_space<vmem>>, %arg10: memref<1x128xf32, #tpu.memory_space<vmem>>, %arg11: memref<1x1xf32, #tpu.memory_space<vmem>>, %arg12: memref<8x1xf32, #tpu.memory_space<vmem>>) attributes {dimension_semantics = [#tpu.dimension_semantics<parallel>], iteration_bounds = array<i64: 1>, scalar_prefetch = 0 : i64, scratch_operands = 0 : i64, tpu.core_type = #tpu.core_type<tc>, window_params = [{transform_indices = @transform_0, window_bounds = array<i64: 8, 32>}, {transform_indices = @transform_1, window_bounds = array<i64: 8, 4>}, {transform_indices = @transform_2, window_bounds = array<i64: 8, 32>}, {pipeline_mode = #tpu.pipeline_mode<synchronous>, transform_indices = @transform_3, window_bounds = array<i64: 32, 128>}, {pipeline_mode = #tpu.pipeline_mode<synchronous>, transform_indices = @transform_4, window_bounds = array<i64: 4, 128>}, {pipeline_mode = #tpu.pipeline_mode<synchronous>, transform_indices = @transform_5, window_bounds = array<i64: 32, 128>}, {pipeline_mode = #tpu.pipeline_mode<synchronous>, transform_indices = @transform_6, window_bounds = array<i64: 1, 128>}, {pipeline_mode = #tpu.pipeline_mode<synchronous>, transform_indices = @transform_7, window_bounds = array<i64: 128, 128>}, {pipeline_mode = #tpu.pipeline_mode<synchronous>, transform_indices = @transform_8, window_bounds = array<i64: 1, 128>}, {pipeline_mode = #tpu.pipeline_mode<synchronous>, transform_indices = @transform_9, window_bounds = array<i64: 1, 128>}, {pipeline_mode = #tpu.pipeline_mode<synchronous>, transform_indices = @transform_10, window_bounds = array<i64: 1, 1>}, {transform_indices = @transform_11, window_bounds = array<i64: 8, 1>}]} {
    %c0 = arith.constant 0 : index
    %c0_0 = arith.constant 0 : index
    %0 = vector.load %arg1[%c0, %c0_0] : memref<8x32xf32, #tpu.memory_space<vmem>>, vector<8x32xf32>
    %1 = arith.truncf %0 : vector<8x32xf32> to vector<8x32xbf16>
    %c0_1 = arith.constant 0 : index
    %c0_2 = arith.constant 0 : index
    %2 = vector.load %arg4[%c0_1, %c0_2] : memref<32x128xf32, #tpu.memory_space<vmem>>, vector<32x128xf32>
    %3 = arith.truncf %2 : vector<32x128xf32> to vector<32x128xbf16>
    %cst = arith.constant dense<0.000000e+00> : vector<8x128xf32>
    %4 = tpu.matmul %1, %3, %cst {dimension_numbers = #tpu.dot_dimension_numbers<[1], [0], [0], [1], [0, 0, 1, 1], [], []>} : vector<8x32xbf16>, vector<32x128xbf16>, vector<8x128xf32> -> vector<8x128xf32>
    %c0_3 = arith.constant 0 : index
    %c0_4 = arith.constant 0 : index
    %5 = vector.load %arg2[%c0_3, %c0_4] : memref<8x4xf32, #tpu.memory_space<vmem>>, vector<8x4xf32>
    %6 = arith.truncf %5 : vector<8x4xf32> to vector<8x4xbf16>
    %c0_5 = arith.constant 0 : index
    %c0_6 = arith.constant 0 : index
    %7 = vector.load %arg5[%c0_5, %c0_6] : memref<4x128xf32, #tpu.memory_space<vmem>>, vector<4x128xf32>
    %8 = arith.truncf %7 : vector<4x128xf32> to vector<4x128xbf16>
    %cst_7 = arith.constant dense<0.000000e+00> : vector<8x128xf32>
    %9 = tpu.matmul %6, %8, %cst_7 {dimension_numbers = #tpu.dot_dimension_numbers<[1], [0], [0], [1], [0, 0, 1, 1], [], []>} : vector<8x4xbf16>, vector<4x128xbf16>, vector<8x128xf32> -> vector<8x128xf32>
    %10 = arith.addf %4, %9 : vector<8x128xf32>
    %c0_8 = arith.constant 0 : index
    %c0_9 = arith.constant 0 : index
    %11 = vector.load %arg3[%c0_8, %c0_9] : memref<8x32xf32, #tpu.memory_space<vmem>>, vector<8x32xf32>
    %12 = arith.truncf %11 : vector<8x32xf32> to vector<8x32xbf16>
    %c0_10 = arith.constant 0 : index
    %c0_11 = arith.constant 0 : index
    %13 = vector.load %arg6[%c0_10, %c0_11] : memref<32x128xf32, #tpu.memory_space<vmem>>, vector<32x128xf32>
    %14 = arith.truncf %13 : vector<32x128xf32> to vector<32x128xbf16>
    %cst_12 = arith.constant dense<0.000000e+00> : vector<8x128xf32>
    %15 = tpu.matmul %12, %14, %cst_12 {dimension_numbers = #tpu.dot_dimension_numbers<[1], [0], [0], [1], [0, 0, 1, 1], [], []>} : vector<8x32xbf16>, vector<32x128xbf16>, vector<8x128xf32> -> vector<8x128xf32>
    %16 = arith.addf %10, %15 : vector<8x128xf32>
    %c0_13 = arith.constant 0 : index
    %c0_14 = arith.constant 0 : index
    %17 = vector.load %arg7[%c0_13, %c0_14] : memref<1x128xf32, #tpu.memory_space<vmem>>, vector<1x128xf32>
    %18 = vector.broadcast %17 : vector<1x128xf32> to vector<8x128xf32>
    %19 = arith.addf %16, %18 : vector<8x128xf32>
    %cst_15 = arith.constant 2.000000e+01 : f32
    %20 = vector.broadcast %cst_15 : f32 to vector<8x128xf32>
    %21 = arith.minimumf %19, %20 : vector<8x128xf32>
    %22 = math.exp %21 : vector<8x128xf32>
    %cst_16 = arith.constant 1.000000e+00 : f32
    %23 = vector.broadcast %cst_16 : f32 to vector<8x128xf32>
    %24 = arith.addf %23, %22 : vector<8x128xf32>
    %cst_17 = arith.constant 1.000000e+00 : f32
    %25 = vector.broadcast %cst_17 : f32 to vector<8x128xf32>
    %26 = arith.addf %25, %22 : vector<8x128xf32>
    %27 = arith.mulf %24, %26 : vector<8x128xf32>
    %cst_18 = arith.constant 1.000000e+00 : f32
    %28 = vector.broadcast %cst_18 : f32 to vector<8x128xf32>
    %29 = arith.subf %27, %28 : vector<8x128xf32>
    %30 = arith.mulf %19, %29 : vector<8x128xf32>
    %cst_19 = arith.constant 1.000000e+00 : f32
    %31 = vector.broadcast %cst_19 : f32 to vector<8x128xf32>
    %32 = arith.addf %27, %31 : vector<8x128xf32>
    %33 = tpu.reciprocal %32 {approx = true} : vector<8x128xf32> -> vector<8x128xf32>
    %34 = arith.mulf %30, %33 : vector<8x128xf32>
    %35 = arith.truncf %34 : vector<8x128xf32> to vector<8x128xbf16>
    %c0_20 = arith.constant 0 : index
    %c0_21 = arith.constant 0 : index
    %36 = vector.load %arg8[%c0_20, %c0_21] : memref<128x128xf32, #tpu.memory_space<vmem>>, vector<128x128xf32>
    %37 = arith.truncf %36 : vector<128x128xf32> to vector<128x128xbf16>
    %cst_22 = arith.constant dense<0.000000e+00> : vector<8x128xf32>
    %38 = tpu.matmul %35, %37, %cst_22 {dimension_numbers = #tpu.dot_dimension_numbers<[1], [0], [0], [1], [0, 0, 1, 1], [], []>} : vector<8x128xbf16>, vector<128x128xbf16>, vector<8x128xf32> -> vector<8x128xf32>
    %c0_23 = arith.constant 0 : index
    %c0_24 = arith.constant 0 : index
    %39 = vector.load %arg9[%c0_23, %c0_24] : memref<1x128xf32, #tpu.memory_space<vmem>>, vector<1x128xf32>
    %40 = vector.broadcast %39 : vector<1x128xf32> to vector<8x128xf32>
    %41 = arith.addf %38, %40 : vector<8x128xf32>
    %cst_25 = arith.constant 2.000000e+01 : f32
    %42 = vector.broadcast %cst_25 : f32 to vector<8x128xf32>
    %43 = arith.minimumf %41, %42 : vector<8x128xf32>
    %44 = math.exp %43 : vector<8x128xf32>
    %cst_26 = arith.constant 1.000000e+00 : f32
    %45 = vector.broadcast %cst_26 : f32 to vector<8x128xf32>
    %46 = arith.addf %45, %44 : vector<8x128xf32>
    %cst_27 = arith.constant 1.000000e+00 : f32
    %47 = vector.broadcast %cst_27 : f32 to vector<8x128xf32>
    %48 = arith.addf %47, %44 : vector<8x128xf32>
    %49 = arith.mulf %46, %48 : vector<8x128xf32>
    %cst_28 = arith.constant 1.000000e+00 : f32
    %50 = vector.broadcast %cst_28 : f32 to vector<8x128xf32>
    %51 = arith.subf %49, %50 : vector<8x128xf32>
    %52 = arith.mulf %41, %51 : vector<8x128xf32>
    %cst_29 = arith.constant 1.000000e+00 : f32
    %53 = vector.broadcast %cst_29 : f32 to vector<8x128xf32>
    %54 = arith.addf %49, %53 : vector<8x128xf32>
    %55 = tpu.reciprocal %54 {approx = true} : vector<8x128xf32> -> vector<8x128xf32>
    %56 = arith.mulf %52, %55 : vector<8x128xf32>
    %c0_30 = arith.constant 0 : index
    %c0_31 = arith.constant 0 : index
    %57 = vector.load %arg10[%c0_30, %c0_31] : memref<1x128xf32, #tpu.memory_space<vmem>>, vector<1x128xf32>
    %58 = vector.broadcast %57 : vector<1x128xf32> to vector<8x128xf32>
    %59 = arith.mulf %56, %58 : vector<8x128xf32>
    %cst_32 = arith.constant dense<0.000000e+00> : vector<8xf32>
    %60 = vector.multi_reduction <add>, %59, %cst_32 [1] : vector<8x128xf32> to vector<8xf32>
    %61 = vector.shape_cast %60 : vector<8xf32> to vector<8x1xf32>
    %c0_33 = arith.constant 0 : index
    %c0_34 = arith.constant 0 : index
    %62 = vector.load %arg11[%c0_33, %c0_34] : memref<1x1xf32, #tpu.memory_space<vmem>>, vector<1x1xf32>
    %63 = vector.broadcast %62 : vector<1x1xf32> to vector<8x1xf32>
    %64 = arith.addf %61, %63 : vector<8x1xf32>
    %cst_35 = arith.constant 0.000000e+00 : f32
    %65 = vector.broadcast %cst_35 : f32 to vector<8x1xf32>
    %66 = arith.subf %65, %64 : vector<8x1xf32>
    %67 = math.exp %66 : vector<8x1xf32>
    %cst_36 = arith.constant 1.000000e+00 : f32
    %68 = vector.broadcast %cst_36 : f32 to vector<8x1xf32>
    %69 = arith.addf %68, %67 : vector<8x1xf32>
    %cst_37 = arith.constant 1.000000e+00 : f32
    %70 = vector.broadcast %cst_37 : f32 to vector<8x1xf32>
    %71 = arith.divf %70, %69 : vector<8x1xf32>
    %c0_38 = arith.constant 0 : index
    %c0_39 = arith.constant 0 : index
    %72 = vector.load %arg12[%c0_38, %c0_39] : memref<8x1xf32, #tpu.memory_space<vmem>>, vector<8x1xf32>
    tpu.vector_store %arg12[%c0_38, %c0_39], %71 {strides = array<i32>} : memref<8x1xf32, #tpu.memory_space<vmem>>, vector<8x1xf32>,
    return
  }
  func.func @transform_0(%arg0: i32) -> (i32, i32) {
    %c0_i32 = arith.constant 0 : i32
    %c0_i32_0 = arith.constant 0 : i32
    return %arg0, %c0_i32 : i32, i32
  }
  func.func @transform_1(%arg0: i32) -> (i32, i32) {
    %c0_i32 = arith.constant 0 : i32
    %c0_i32_0 = arith.constant 0 : i32
    return %arg0, %c0_i32 : i32, i32
  }
  func.func @transform_2(%arg0: i32) -> (i32, i32) {
    %c0_i32 = arith.constant 0 : i32
    %c0_i32_0 = arith.constant 0 : i32
    return %arg0, %c0_i32 : i32, i32
  }
  func.func @transform_3(%arg0: i32) -> (i32, i32) {
    %c0_i32 = arith.constant 0 : i32
    %c0_i32_0 = arith.constant 0 : i32
    %c0_i32_1 = arith.constant 0 : i32
    return %c0_i32, %c0_i32_0 : i32, i32
  }
  func.func @transform_4(%arg0: i32) -> (i32, i32) {
    %c0_i32 = arith.constant 0 : i32
    %c0_i32_0 = arith.constant 0 : i32
    %c0_i32_1 = arith.constant 0 : i32
    return %c0_i32, %c0_i32_0 : i32, i32
  }
  func.func @transform_5(%arg0: i32) -> (i32, i32) {
    %c0_i32 = arith.constant 0 : i32
    %c0_i32_0 = arith.constant 0 : i32
    %c0_i32_1 = arith.constant 0 : i32
    return %c0_i32, %c0_i32_0 : i32, i32
  }
  func.func @transform_6(%arg0: i32) -> (i32, i32) {
    %c0_i32 = arith.constant 0 : i32
    %c0_i32_0 = arith.constant 0 : i32
    %c0_i32_1 = arith.constant 0 : i32
    return %c0_i32, %c0_i32_0 : i32, i32
  }
  func.func @transform_7(%arg0: i32) -> (i32, i32) {
    %c0_i32 = arith.constant 0 : i32
    %c0_i32_0 = arith.constant 0 : i32
    %c0_i32_1 = arith.constant 0 : i32
    return %c0_i32, %c0_i32_0 : i32, i32
  }
  func.func @transform_8(%arg0: i32) -> (i32, i32) {
    %c0_i32 = arith.constant 0 : i32
    %c0_i32_0 = arith.constant 0 : i32
    %c0_i32_1 = arith.constant 0 : i32
    return %c0_i32, %c0_i32_0 : i32, i32
  }
  func.func @transform_9(%arg0: i32) -> (i32, i32) {
    %c0_i32 = arith.constant 0 : i32
    %c0_i32_0 = arith.constant 0 : i32
    %c0_i32_1 = arith.constant 0 : i32
    return %c0_i32, %c0_i32_0 : i32, i32
  }
  func.func @transform_10(%arg0: i32) -> (i32, i32) {
    %c0_i32 = arith.constant 0 : i32
    %c0_i32_0 = arith.constant 0 : i32
    %c0_i32_1 = arith.constant 0 : i32
    return %c0_i32, %c0_i32_0 : i32, i32
  }
  func.func @transform_11(%arg0: i32) -> (i32, i32) {
    %c0_i32 = arith.constant 0 : i32
    %c0_i32_0 = arith.constant 0 : i32
    return %arg0, %c0_i32 : i32, i32
  }
}

</mosaic_0001>

<bundles_post_ra>
// kernel: tpu_custom_call.1
= control target key start
LH: loop header
LB: loop body
LE: loop exit
PB: predicated region body
PF: predicated region fallthrough
CT: control target
= control target key end

     0   :  { %s645_s0 = inlined_call_operand.vmem [shape: f32[8,32], index: 0, kind: input, shape index: {}]   ;;  %s646_s1 = inlined_call_operand.vmem [shape: f32[8,4], index: 1, kind: input, shape index: {}]   ;;  %s647_s2 = inlined_call_operand.vmem [shape: f32[8,32], index: 2, kind: input, shape index: {}]   ;;  %s648_s3 = inlined_call_operand.hbm [shape: f32[32,128], index: 3, kind: input, shape index: {}]   ;;  %s649_s4 = inlined_call_operand.vmem [shape: f32[4,128], index: 4, kind: input, shape index: {}]   ;;  %s650_s5 = inlined_call_operand.hbm [shape: f32[32,128], index: 5, kind: input, shape index: {}]   ;;  %s651_s6 = inlined_call_operand.vmem [shape: f32[1,128], index: 6, kind: input, shape index: {}]   ;;  %s652_s7 = inlined_call_operand.hbm [shape: f32[128,128], index: 7, kind: input, shape index: {}]   ;;  %s653_s8 = inlined_call_operand.vmem [shape: f32[1,128], index: 8, kind: input, shape index: {}]   ;;  %s654_s9 = inlined_call_operand.vmem [shape: f32[1,128], index: 9, kind: input, shape index: {}]   ;;  %s655_s10 = inlined_call_operand.<no memory space> [shape: f32[1,1], index: 10, kind: input, shape index: {}]   ;;  %s656_s11 = inlined_call_operand.vmem [shape: f32[8,1], index: 11, kind: output, shape index: {}]  }
   0x1   :  { %v16_v0 = vstv %s655_s10 }
   0x2   :  { %17 = vst [vmem:[#allocation2] sm:$0x1] %v16_v0 }
   0x3   :  { %18 = vsyncpa [#allocation4], 0 }
   0x4   :  { %19 = vsyncpa [#allocation6], 0  ;;  %s521_s19 = smov [#allocation5]   ;;  %s522_s21 = smov [#allocation3]  }
   0x5   :  { %s45_s20 = sshll.u32 %s521_s19, 4  ;;  %s31_s22 = sshll.u32 %s522_s21, 4  ;;  %s46_s20 = int_to_ptr.vmem [resolvable:$true] %s45_s20  ;;  %s32_s22 = int_to_ptr.vmem [resolvable:$true] %s31_s22 }
   0x6   :  { %s465_s23 = scalar_lea.vmem %s46_s20, 512  ;;  %p470_p1 = scmp.lt.s32.totalorder %s46_s20, %s46_s20 }
   0x7   :  { %p466_p0 = scmp.ne.s32.totalorder %s46_s20, %s465_s23  ;;  %p471_p2 = scmp.lt.s32.totalorder %s465_s23, %s465_s23 }
   0x9   :  { %p472_p3 = por %p471_p2, %p470_p1 }
   0xb   :  { %p473_p4 = pnand %p472_p3, %p466_p0 }
   0xd   :  { %476 = shalt.err (!%p473_p4)
}
   0xe   :  { %s523_s24 = smov 128   ;;  %s524_s25 = smov 8  }
   0xf   :  { %51 = dma.hbm_to_vmem [thread:$0]  %s650_s5, 512, %s46_s20, [#allocation6], %s523_s24, %s523_s24, %s524_s25  }
  0x10   :  { %s485_s27 = scalar_lea.vmem %s32_s22, 512  ;;  %p490_p6 = scmp.lt.s32.totalorder %s32_s22, %s32_s22 }
  0x11   :  { %p486_p5 = scmp.ne.s32.totalorder %s32_s22, %s485_s27  ;;  %p491_p7 = scmp.lt.s32.totalorder %s485_s27, %s485_s27 }
  0x13   :  { %p492_p8 = por %p491_p7, %p490_p6 }
  0x15   :  { %p493_p9 = pnand %p492_p8, %p486_p5 }
  0x17   :  { %496 = shalt.err (!%p493_p9)
}
  0x18   :  { %37 = dma.hbm_to_vmem [thread:$0]  %s648_s3, 512, %s32_s22, [#allocation4], %s523_s24, %s523_s24, %s524_s25  }
  0x19   :  { %s525_s30 = smov [#allocation7]  }
  0x1a   :  { %s59_s12 = sshll.u32 %s525_s30, 4  ;;  %s60_s12 = int_to_ptr.vmem [resolvable:$true] %s59_s12 }
  0x1b   :  { %s505_s13 = scalar_lea.vmem %s60_s12, 2048  ;;  %p510_p11 = scmp.lt.s32.totalorder %s60_s12, %s60_s12 }
  0x1c   :  { %p506_p10 = scmp.ne.s32.totalorder %s60_s12, %s505_s13  ;;  %p511_p12 = scmp.lt.s32.totalorder %s505_s13, %s505_s13 }
  0x1e   :  { %p512_p13 = por %p511_p12, %p510_p11 }
  0x20   :  { %p513_p0 = pnand %p512_p13, %p506_p10 }
  0x22   :  { %516 = shalt.err (!%p513_p0)
}
  0x23   :  { %65 = dma.hbm_to_vmem [thread:$0]  %s652_s7, 2048, %s60_s12, [#allocation6], %s523_s24, %s523_s24, %s524_s25  }
  0x24   :  { %517 = dma.done.wait [#allocation4], 512  }
  0x25   :  { %518 = vsyncadd [#allocation4], 4294966784 }
  0x26   :  { %519 = dma.done.wait [#allocation6], 2560  }
  0x27   :  { %520 = vsyncadd [#allocation6], 4294964736  ;;  %v526_v1 = vmov 0.0   ;;  %vm527_vm0 = vmmov 0   ;;  %v92_v2 = vld [vmem:[%s649_s4] sm:$0xf] }
  0x28   :  { %396 = vmatprep.subr.bf16.mxu0 %v526_v1  ;;  %398 = vmatprep.mubr.msk.bf16.mxu0 %vm527_vm0, %v526_v1  ;;  %vm98_vm1 = vcmask 1041408   ;;  %v90_v3 = vld [vmem:[%s646_s1] sm:$0xff]  ;;  %v93_v4 = vpack.c.bf16 %v92_v2, %v92_v2  ;;  %v86_v5 = vld [vmem:[#allocation3 + $0x10] sm:$0xff]  ;;  %vm94_vm2 = vcmask 31744   ;;  %v85_v11 = vld [vmem:[#allocation3 + $0x8] sm:$0xff]  ;;  %vm142_vm3 = vcmask 261120  }
  0x29   :  { %418 = vmatprep.subr.bf16.mxu1 %v526_v1  ;;  %434 = vmatprep.mubr.msk.bf16.mxu1 %vm527_vm0, %v526_v1  ;;  %v87_v6 = vld [vmem:[#allocation3 + $0x18] sm:$0xff]  ;;  %v91_v8 = vpack.c.bf16 %v90_v3, %v90_v3  ;;  %v84_v10 = vld [vmem:[#allocation3] sm:$0xff]  ;;  %v190_v14 = vld [vmem:[#allocation5 + $0x10] sm:$0xff]  ;;  %vm362_vm4 = vcmask 7168  }
  0x2a   :  { %v100_v7 = vsel %vm98_vm1, %v93_v4, 0  ;;  %v89_v9 = vpack.c.bf16 %v87_v6, %v86_v5  ;;  %v88_v12 = vpack.c.bf16 %v85_v11, %v84_v10  ;;  %v82_v13 = vld [vmem:[%s645_s0] sm:$0xff]  ;;  %v189_v19 = vld [vmem:[#allocation5 + $0x8] sm:$0xff]  ;;  %v271_v23 = vld [vmem:[#allocation7 + $0x70] sm:$0xff] }
  0x2b   :  { %397 = vmatpush3.bf16.msra.mxu0 %v100_v7  ;;  %v191_v15 = vld [vmem:[#allocation5 + $0x18] sm:$0xff]  ;;  %v83_v16 = vpack.c.bf16 %v82_v13, %v82_v13  ;;  %v188_v18 = vld [vmem:[#allocation5] sm:$0xff]  ;;  %v270_v27 = vld [vmem:[#allocation7 + $0x68] sm:$0xff] }
  0x2c   :  { %402 = vmatprep.subr.bf16.mxu0 %v526_v1  ;;  %v193_v17 = vpack.c.bf16 %v191_v15, %v190_v14  ;;  %v192_v20 = vpack.c.bf16 %v189_v19, %v188_v18  ;;  %v186_v21 = vld [vmem:[%s647_s2] sm:$0xff]  ;;  %v267_v29 = vld [vmem:[#allocation7 + $0x50] sm:$0xff]  ;;  %v266_v33 = vld [vmem:[#allocation7 + $0x48] sm:$0xff] }
  0x2d   :  { %v187_v22 = vpack.c.bf16 %v186_v21, %v186_v21  ;;  %v272_v24 = vld [vmem:[#allocation7 + $0x78] sm:$0xff]  ;;  %v269_v26 = vld [vmem:[#allocation7 + $0x60] sm:$0xff]  ;;  %v263_v35 = vld [vmem:[#allocation7 + $0x30] sm:$0xff] }
  0x2e   :  { %399 = vmatmul.mubr.msk.bf16.vlgmr.msra.gmra.mxu0 %vm94_vm2, %v91_v8  ;;  %v280_v25 = vpack.c.bf16 %v272_v24, %v271_v23  ;;  %v279_v28 = vpack.c.bf16 %v270_v27, %v269_v26  ;;  %v268_v30 = vld [vmem:[#allocation7 + $0x58] sm:$0xff]  ;;  %v265_v32 = vld [vmem:[#allocation7 + $0x40] sm:$0xff]  ;;  %v262_v39 = vld [vmem:[#allocation7 + $0x28] sm:$0xff] }
  0x2f   :  { %403 = vmatpush3.bf16.msra.mxu0 %v89_v9  ;;  %406 = vmatprep.mubr.msk.bf16.mxu0 %vm527_vm0, %v526_v1  ;;  %v278_v31 = vpack.c.bf16 %v268_v30, %v267_v29  ;;  %v277_v34 = vpack.c.bf16 %v266_v33, %v265_v32  ;;  %v264_v36 = vld [vmem:[#allocation7 + $0x38] sm:$0xff]  ;;  %v261_v37 = vld [vmem:[#allocation7 + $0x20] sm:$0xff]  ;;  %v259_v41 = vld [vmem:[#allocation7 + $0x10] sm:$0xff] }
  0x30   :  { %404 = vmatprep.subr.bf16.mxu0 %v526_v1  ;;  %419 = vmatpush3.bf16.msra.mxu1 %v280_v25  ;;  %v276_v38 = vpack.c.bf16 %v264_v36, %v263_v35  ;;  %v275_v40 = vpack.c.bf16 %v262_v39, %v261_v37  ;;  %v260_v42 = vld [vmem:[#allocation7 + $0x18] sm:$0xff]  ;;  %v257_v44 = vld [vmem:[#allocation7] sm:$0xff]  ;;  %v258_v45 = vld [vmem:[#allocation7 + $0x8] sm:$0xff] }
  0x31   :  { %420 = vmatprep.subr.bf16.mxu1 %v526_v1  ;;  %v274_v43 = vpack.c.bf16 %v260_v42, %v259_v41  ;;  %v273_v46 = vpack.c.bf16 %v258_v45, %v257_v44  ;;  %v373_v57 = vld [vmem:[%s651_s6] ss:$0 sm:$0xff] }
  0x32   :  { %v375_v10 = vld [vmem:[%s653_s8] ss:$0 sm:$0xff] }
  0x33   :  { %405 = vmatpush3.bf16.msra.mxu0 %v88_v12  ;;  %v377_v25 = vld [vmem:[%s654_s9] ss:$0 sm:$0xff] }
  0x34   :  { %410 = vmatprep.subr.bf16.mxu0 %v526_v1  ;;  %421 = vmatpush3.bf16.msra.mxu1 %v279_v28  ;;  %v378_v28 = vld [vmem:[#allocation2] ss:$0 sm:$0xff] }
  0x35   :  { %422 = vmatprep.subr.bf16.mxu1 %v526_v1 }
  0x36   :  { %407 = vmatmul.mubr.msk.bf16.vlgmr.msra.gmra.mxu0 %vm142_vm3, %v83_v16 }
  0x37   :  { %411 = vmatpush3.bf16.msra.mxu0 %v193_v17  ;;  %414 = vmatprep.mubr.msk.bf16.mxu0 %vm527_vm0, %v526_v1 }
  0x38   :  { %412 = vmatprep.subr.bf16.mxu0 %v526_v1  ;;  %423 = vmatpush3.bf16.msra.mxu1 %v278_v31 }
  0x39   :  { %424 = vmatprep.subr.bf16.mxu1 %v526_v1 }
  0x3b   :  { %413 = vmatpush3.bf16.msra.mxu0 %v192_v20 }
  0x3c   :  { %425 = vmatpush3.bf16.msra.mxu1 %v277_v34 }
  0x3d   :  { %426 = vmatprep.subr.bf16.mxu1 %v526_v1 }
  0x3e   :  { %415 = vmatmul.mubr.msk.bf16.vlgmr.msra.gmra.mxu0 %vm142_vm3, %v187_v22 }
  0x40   :  { %427 = vmatpush3.bf16.msra.mxu1 %v276_v38 }
  0x41   :  { %428 = vmatprep.subr.bf16.mxu1 %v526_v1 }
  0x44   :  { %429 = vmatpush3.bf16.msra.mxu1 %v275_v40 }
  0x45   :  { %430 = vmatprep.subr.bf16.mxu1 %v526_v1 }
  0x48   :  { %431 = vmatpush3.bf16.msra.mxu1 %v274_v43 }
  0x49   :  { %432 = vmatprep.subr.bf16.mxu1 %v526_v1 }
  0x4c   :  { %433 = vmatpush3.bf16.msra.mxu1 %v273_v46 }
  0xee   :  { %v136_v47 = vpop.f32.mrf.mxu0 }
  0xf0   :  { %v400_v48 = vpop.f32.mrf.mxu0 }
  0xf2   :  { %v139_v49 = vpop.f32.mrf.mxu0 }
  0xf4   :  { %v401_v50 = vpop.f32.mrf.mxu0 }
  0xf6   :  { %v180_v51 = vpop.f32.mrf.mxu0 }
  0xf7   :  { %v181_v55 = vadd.f32 %v180_v51, %v136_v47 }
  0xf8   :  { %v408_v52 = vpop.f32.mrf.mxu0 }
  0xfa   :  { %v183_v53 = vpop.f32.mrf.mxu0 }
  0xfc   :  { %v409_v54 = vpop.f32.mrf.mxu0 }
  0xfe   :  { %v231_v56 = vpop.f32.mrf.mxu0 }
  0xff   :  { %v237_v58 = vadd.f32 %v231_v56, %v181_v55 }
 0x100   :  { %v416_v59 = vpop.f32.mrf.mxu0 }
 0x101   :  { %v245_v60 = vadd.f32 %v373_v57, %v237_v58 }
 0x102   :  { %v234_v61 = vpop.f32.mrf.mxu0 }
 0x103   :  { %v246_v62 = vmin.f32 %v245_v60, 20.0 }
 0x104   :  { %v417_v63 = vpop.f32.mrf.mxu0 }
 0x105   :  { %v247_v0 = vmul.f32 1.442695, %v246_v62 }
 0x107   :  { %445 = vpow2.f32 %v247_v0 }
 0x114   :  { %v446_v1 = vpop.eup %445 }
 0x115   :  { %v249_v2 = vadd.f32 1.0, %v446_v1 }
 0x117   :  { %v250_v3 = vmul.f32 %v249_v2, %v249_v2 }
 0x119   :  { %v253_v4 = vadd.f32 1.0, %v250_v3  ;;  %v374_v5 = vadd.f32 -1.0, %v250_v3 }
 0x11b   :  { %447 = vrcp.f32 %v253_v4  ;;  %v252_v6 = vmul.f32 %v374_v5, %v245_v60 }
 0x128   :  { %v448_v7 = vpop.eup %447 }
 0x129   :  { %v255_v8 = vmul.f32 %v448_v7, %v252_v6 }
 0x12b   :  { %v256_v9 = vpack.c.bf16 %v255_v8, %v255_v8 }
 0x12d   :  { %435 = vmatmul.mubr.bf16.vlgmr.msra.gmra.mxu1 %v256_v9 }
 0x1ed   :  { %v322_v11 = vpop.f32.mrf.mxu1 }
 0x1ee   :  { %v323_v12 = vadd.f32 %v375_v10, %v322_v11 }
 0x1ef   :  { %v436_v13 = vpop.f32.mrf.mxu1 }
 0x1f0   :  { %v328_v14 = vmin.f32 %v323_v12, 20.0 }
 0x1f1   :  { %v325_v15 = vpop.f32.mrf.mxu1 }
 0x1f2   :  { %v329_v16 = vmul.f32 1.442695, %v328_v14 }
 0x1f3   :  { %v437_v17 = vpop.f32.mrf.mxu1 }
 0x1f4   :  { %449 = vpow2.f32 %v329_v16 }
 0x201   :  { %v450_v18 = vpop.eup %449 }
 0x202   :  { %v331_v19 = vadd.f32 1.0, %v450_v18 }
 0x204   :  { %v332_v20 = vmul.f32 %v331_v19, %v331_v19 }
 0x206   :  { %v335_v21 = vadd.f32 1.0, %v332_v20  ;;  %v376_v22 = vadd.f32 -1.0, %v332_v20 }
 0x208   :  { %451 = vrcp.f32 %v335_v21  ;;  %v334_v23 = vmul.f32 %v376_v22, %v323_v12 }
 0x215   :  { %v452_v24 = vpop.eup %451 }
 0x216   :  { %v337_v26 = vmul.f32 %v452_v24, %v334_v23 }
 0x218   :  { %v345_v27 = vmul.f32 %v377_v25, %v337_v26 }
 0x21a   :  { %346 = vadd.xlane.f32.xlu0 %v345_v27 }
 0x2a3   :  { %v347_v29 = vpop.xlane.xlu0 %346 }
 0x2a4   :  { %v355_v30 = vadd.f32 %v378_v28, %v347_v29 }
 0x2a6   :  { %v356_v31 = vsub.f32 0.0, %v355_v30 }
 0x2a8   :  { %v357_v32 = vmul.f32 1.442695, %v356_v31 }
 0x2aa   :  { %453 = vpow2.f32 %v357_v32 }
 0x2b7   :  { %v454_v33 = vpop.eup %453 }
 0x2b8   :  { %v359_v34 = vadd.f32 1.0, %v454_v33 }
 0x2ba   :  { %455 = vrcp.f32 %v359_v34 }
 0x2c7   :  { %v456_v35 = vpop.eup %455 }
 0x2c8   :  { %363 = vst.msk [vmem:[%s656_s11] sm:$0xff] %vm362_vm4, %v456_v35 }
 0x2c9   :  { %368 = vsyncpa [#allocation4], 1 }
 0x2ca   :  { %369 = vsyncpa [#allocation6], 1 }

</bundles_post_ra>
